<compile_context>
chip_gen: v7x
topology: tpu7x:2x2x1
jax: 0.10.0
libtpu: 0.0.40
codegen_flags: <defaults>
</compile_context>

<pallas_src>
import math

import jax
import jax.numpy as jnp
from jax.experimental import pallas as pl
from jax.experimental.pallas import tpu as pltpu

_LANES = 128                               # vreg lane width
_SUBLANES = 8                              # f32 sublanes per vreg
_TARGET_BLOCK_BYTES = 4 * 1024 * 1024      # per-side block size target
_VMEM_LIMIT_BYTES = 32 * 1024 * 1024       # <= physical VMEM on v5e/v6e/v7x


def _round_down(a, b):
    return (a // b) * b


def _copy_kernel(x_ref, o_ref):
    # Straight copy of the current block (pure data movement, no compute).
    o_ref[...] = x_ref[...]


def _streaming_copy_2d(x2d: jax.Array) -> jax.Array:
    """Identity copy of a 2D array through VMEM with large, dense blocks."""
    rows, cols = x2d.shape
    itemsize = jnp.dtype(x2d.dtype).itemsize

    # Lane-axis tile: full extent if it fits the budget, else a large multiple
    # of 128 (boundary blocks are masked automatically via the cdiv grid).
    budget_cols = max(
        _LANES,
        _round_down(_TARGET_BLOCK_BYTES // (_SUBLANES * itemsize), _LANES))
    tile_cols = cols if cols <= budget_cols else budget_cols

    # Sublane-axis tile: multiple of 8 sized so one block is ~TARGET bytes.
    budget_rows = max(
        _SUBLANES,
        _round_down(_TARGET_BLOCK_BYTES // (tile_cols * itemsize), _SUBLANES))
    tile_rows = rows if rows <= budget_rows else budget_rows

    grid = (pl.cdiv(rows, tile_rows), pl.cdiv(cols, tile_cols))
    total_bytes = rows * cols * itemsize

    return pl.pallas_call(
        _copy_kernel,
        out_shape=jax.ShapeDtypeStruct((rows, cols), x2d.dtype),
        grid_spec=pltpu.PrefetchScalarGridSpec(
            num_scalar_prefetch=0,
            grid=grid,
            in_specs=[pl.BlockSpec((tile_rows, tile_cols), lambda i, j: (i, j))],
            out_specs=pl.BlockSpec((tile_rows, tile_cols), lambda i, j: (i, j)),
        ),
        compiler_params=pltpu.CompilerParams(
            dimension_semantics=("parallel", "parallel"),
            vmem_limit_bytes=_VMEM_LIMIT_BYTES,
        ),
        cost_estimate=pl.CostEstimate(
            flops=0, transcendentals=0, bytes_accessed=2 * total_bytes),
    )(x2d)


def _flatten_impl(x: jax.Array) -> jax.Array:
    """Equivalent of torch x.view(x.size(0), -1) for a contiguous input."""
    n = x.shape[0]
    f = math.prod(x.shape[1:])  # == 1 for 1-D input, matching .view(N, -1)
    total = n * f

    # Metadata-only (bitcast under jit) retiling of the flat row-major data
    # into a copy-friendly 2D layout: lanes a large multiple of 128, rows
    # decoupled from the (possibly tiny / odd) batch dim.
    if total % _LANES == 0:
        lanes = _LANES
        for cand in (2048, 1024, 512, 256):
            if total % cand == 0:
                lanes = cand
                break
        x2d = jnp.reshape(x, (total // lanes, lanes))
    else:
        x2d = jnp.reshape(x, (n, f))

    y2d = _streaming_copy_2d(x2d)
    # Metadata-only reshape back to the torch .view(N, -1) shape.
    return jnp.reshape(y2d, (n, f))


# jit so the surrounding reshapes are pure metadata (bitcasts) and the only
# HBM traffic is the single read+write stream inside the Pallas kernel.
flatten = jax.jit(_flatten_impl)


if __name__ == "__main__":
    key = jax.random.PRNGKey(0)
    # NCHW input: batch=2, channels=4, spatial=16x16.
    x = jax.random.normal(key, (2, 4, 16, 16), dtype=jnp.float32)

    ref = jnp.reshape(x, (x.shape[0], -1))   # == torch x.view(x.size(0), -1)

    out = flatten(x)
    out = jax.block_until_ready(out)

    assert out.shape == (2, 4 * 16 * 16), out.shape
    assert out.dtype == x.dtype
    assert bool(jnp.all(out == ref))

    print("KERNEL_OK")
</pallas_src>

<mosaic_0001>
module attributes {stable_mosaic.version = 11 : i64} {
  func.func @_copy_kernel(%arg0: i32, %arg1: i32, %arg2: memref<1x2048xf32, #tpu.memory_space<vmem>>, %arg3: memref<1x2048xf32, #tpu.memory_space<vmem>>) attributes {dimension_semantics = [#tpu.dimension_semantics<parallel>, #tpu.dimension_semantics<parallel>], iteration_bounds = array<i64: 1, 1>, scalar_prefetch = 0 : i64, scratch_operands = 0 : i64, tpu.core_type = #tpu.core_type<tc>, window_params = [{transform_indices = @transform_0, window_bounds = array<i64: 1, 2048>}, {transform_indices = @transform_1, window_bounds = array<i64: 1, 2048>}]} {
    %c0 = arith.constant 0 : index
    %c0_0 = arith.constant 0 : index
    %0 = vector.load %arg2[%c0, %c0_0] : memref<1x2048xf32, #tpu.memory_space<vmem>>, vector<1x2048xf32>
    %c0_1 = arith.constant 0 : index
    %c0_2 = arith.constant 0 : index
    %1 = vector.load %arg3[%c0_1, %c0_2] : memref<1x2048xf32, #tpu.memory_space<vmem>>, vector<1x2048xf32>
    tpu.vector_store %arg3[%c0_1, %c0_2], %0 {strides = array<i32>} : memref<1x2048xf32, #tpu.memory_space<vmem>>, vector<1x2048xf32>,
    return
  }
  func.func @transform_0(%arg0: i32, %arg1: i32) -> (i32, i32) {
    %c0_i32 = arith.constant 0 : i32
    return %arg0, %arg1 : i32, i32
  }
  func.func @transform_1(%arg0: i32, %arg1: i32) -> (i32, i32) {
    %c0_i32 = arith.constant 0 : i32
    return %arg0, %arg1 : i32, i32
  }
}

</mosaic_0001>

<bundles_post_ra>
// kernel: _flatten_impl.1
= control target key start
LH: loop header
LB: loop body
LE: loop exit
PB: predicated region body
PF: predicated region fallthrough
CT: control target
= control target key end

     0   :  { %s38_s0 = inlined_call_operand.vmem [shape: f32[1,2048], index: 0, kind: input, shape index: {}]   ;;  %s39_s1 = inlined_call_operand.vmem [shape: f32[1,2048], index: 1, kind: output, shape index: {}]  }
   0x1   :  { %v8_v0 = vld [vmem:[%s38_s0] sm:$0xff]  ;;  %v9_v1 = vld [vmem:[%s38_s0 + $0x8] sm:$0xff] }
   0x2   :  { %10 = vst [vmem:[%s39_s1] sm:$0xff] %v8_v0  ;;  %11 = vst [vmem:[%s39_s1 + $0x8] sm:$0xff] %v9_v1 }

</bundles_post_ra>
